<compile_context>
chip_gen: v5e
topology: v5e:2x2
jax: 0.10.0
libtpu: 0.0.40
codegen_flags: <defaults>
</compile_context>

<pallas_src>
import jax
import jax.numpy as jnp
from jax.experimental import pallas as pl
from jax.experimental.pallas import tpu as pltpu

_LANES = 128


def _relu_kernel(x_ref, o_ref):
    # Elementwise max with 0 on the VPU for the current VMEM tile.
    o_ref[...] = jnp.maximum(x_ref[...], jnp.zeros((), x_ref.dtype))


def _relu_2d(x2d: jax.Array, tile_rows: int) -> jax.Array:
    """Run the ReLU kernel over a lane-dense (rows, 128) slab."""
    rows = x2d.shape[0]
    # Full-array block when it fits; otherwise a multiple-of-8 row tile with
    # Pallas handling the ragged last grid block.
    tr = rows if rows <= tile_rows else tile_rows
    grid = (pl.cdiv(rows, tr),)
    return pl.pallas_call(
        _relu_kernel,
        out_shape=jax.ShapeDtypeStruct(x2d.shape, x2d.dtype),
        grid_spec=pltpu.PrefetchScalarGridSpec(
            num_scalar_prefetch=0,
            grid=grid,
            in_specs=[pl.BlockSpec((tr, _LANES), lambda i: (i, 0))],
            out_specs=pl.BlockSpec((tr, _LANES), lambda i: (i, 0)),
        ),
        # Write output in place over the input slab when the caller donates x.
        input_output_aliases={0: 0},
        compiler_params=pltpu.CompilerParams(
            dimension_semantics=("parallel",),
            # 2 arrays x 2 pipeline buffers x 4 MiB blocks = 16 MiB; 48 MiB
            # leaves headroom for internal scratch and is valid on v5e (128
            # MiB), v6e (128 MiB) and v7x (64 MiB physical per TC).
            vmem_limit_bytes=48 * 1024 * 1024,
        ),
    )(x2d)


def custom_relu(x: jax.Array, *, block_bytes: int = 4 * 1024 * 1024) -> jax.Array:
    """ReLU(x) computed in a Pallas TPU kernel. Matches torch semantics:
    same shape, same dtype, elementwise max(x, 0) (NaNs propagate)."""
    orig_shape = x.shape
    dtype = x.dtype
    n = x.size
    if n == 0:
        return x

    # Block rows scaled by dtype so the VMEM block stays ~block_bytes in bytes
    # (e.g. 4 MiB -> 8192 rows f32, 16384 rows bf16, 32768 rows int8).
    itemsize = jnp.dtype(dtype).itemsize
    tile_rows = max(8, (block_bytes // (_LANES * itemsize)) // 8 * 8)

    x_flat = jnp.ravel(x)
    n_main = (n // _LANES) * _LANES

    if n_main == n:
        # Aligned case: zero-copy reshape, no padding, no trailing slice.
        out_flat = _relu_2d(x_flat.reshape(n // _LANES, _LANES), tile_rows).reshape(-1)
    elif n_main == 0:
        # Tiny tensor (< 128 elements): not worth a kernel launch.
        out_flat = jnp.maximum(x_flat, jnp.zeros((), dtype))
    else:
        # Unaligned case: kernel on the 128-aligned prefix, plain jnp.maximum
        # on the < 128-element tail (no full-array pad / slice passes).
        main = _relu_2d(
            x_flat[:n_main].reshape(n_main // _LANES, _LANES), tile_rows
        ).reshape(-1)
        tail = jnp.maximum(x_flat[n_main:], jnp.zeros((), dtype))
        out_flat = jnp.concatenate([main, tail])

    return out_flat.reshape(orig_shape)


if __name__ == "__main__":
    key = jax.random.PRNGKey(0)

    # Small NCHW input consistent with a typical conv activation (aligned path).
    x = jax.random.normal(key, (2, 4, 16, 16), dtype=jnp.float32)
    y = jax.block_until_ready(custom_relu(x))
    y_ref = jnp.maximum(x, 0.0)
    assert y.shape == x.shape and y.dtype == x.dtype
    assert bool(jnp.all(y == y_ref))

    # bf16: exercises dtype-scaled tile sizing.
    xb = x.astype(jnp.bfloat16)
    yb = jax.block_until_ready(custom_relu(xb))
    assert yb.dtype == jnp.bfloat16
    assert bool(jnp.all(yb == jnp.maximum(xb, jnp.zeros((), jnp.bfloat16))))

    # n % 128 == 0 but rows not a multiple of 8: no-pad ragged-rows path.
    x3 = jax.random.normal(jax.random.PRNGKey(2), (3, 128), dtype=jnp.float32)
    y3 = jax.block_until_ready(custom_relu(x3))
    assert bool(jnp.all(y3 == jnp.maximum(x3, 0.0)))

    # n % 128 != 0: kernel on aligned prefix + jnp.maximum tail.
    x4 = jax.random.normal(jax.random.PRNGKey(1), (3, 5, 17), dtype=jnp.float32)
    y4 = jax.block_until_ready(custom_relu(x4))
    assert bool(jnp.all(y4 == jnp.maximum(x4, 0.0)))

    # Tiny (< 128 elements) fallback path.
    x5 = jax.random.normal(jax.random.PRNGKey(3), (3, 5, 7), dtype=jnp.float32)
    y5 = jax.block_until_ready(custom_relu(x5))
    assert bool(jnp.all(y5 == jnp.maximum(x5, 0.0)))

    print("KERNEL_OK")
</pallas_src>

<mosaic_0001>
module attributes {stable_mosaic.version = 11 : i64} {
  func.func @_relu_kernel(%arg0: i32, %arg1: memref<16x128xf32, #tpu.memory_space<vmem>>, %arg2: memref<16x128xf32, #tpu.memory_space<vmem>>) attributes {dimension_semantics = [#tpu.dimension_semantics<parallel>], iteration_bounds = array<i64: 1>, scalar_prefetch = 0 : i64, scratch_operands = 0 : i64, tpu.core_type = #tpu.core_type<tc>, window_params = [{transform_indices = @transform_0, window_bounds = array<i64: 16, 128>}, {transform_indices = @transform_1, window_bounds = array<i64: 16, 128>}]} {
    %c0 = arith.constant 0 : index
    %c0_0 = arith.constant 0 : index
    %0 = vector.load %arg1[%c0, %c0_0] : memref<16x128xf32, #tpu.memory_space<vmem>>, vector<16x128xf32>
    %cst = arith.constant 0.000000e+00 : f32
    %1 = vector.broadcast %cst : f32 to vector<16x128xf32>
    %2 = arith.maximumf %0, %1 : vector<16x128xf32>
    %c0_1 = arith.constant 0 : index
    %c0_2 = arith.constant 0 : index
    %3 = vector.load %arg2[%c0_1, %c0_2] : memref<16x128xf32, #tpu.memory_space<vmem>>, vector<16x128xf32>
    tpu.vector_store %arg2[%c0_1, %c0_2], %2 {strides = array<i32>} : memref<16x128xf32, #tpu.memory_space<vmem>>, vector<16x128xf32>,
    return
  }
  func.func @transform_0(%arg0: i32) -> (i32, i32) {
    %c0_i32 = arith.constant 0 : i32
    %c0_i32_0 = arith.constant 0 : i32
    return %arg0, %c0_i32 : i32, i32
  }
  func.func @transform_1(%arg0: i32) -> (i32, i32) {
    %c0_i32 = arith.constant 0 : i32
    %c0_i32_0 = arith.constant 0 : i32
    return %arg0, %c0_i32 : i32, i32
  }
}

</mosaic_0001>

<bundles_post_ra>
// kernel: tpu_custom_call.1
= control target key start
LH: loop header
LB: loop body
LE: loop exit
PB: predicated region body
PF: predicated region fallthrough
CT: control target
= control target key end

     0   :  { %6 = vsyncpa [#allocation3], 0  ;;  %s126_s0 = inlined_call_operand.hbm [shape: f32[16,128], index: 0, kind: input, shape index: {}, may-alias: {0,1}]   ;;  %s127_s1 = inlined_call_operand.hbm [shape: f32[16,128], index: 1, kind: output, shape index: {}, may-alias: {0,1}]  }
   0x1   :  { %7 = vsyncpa [#allocation4], 0  ;;  %s12_s8 = sshll.u32 %s126_s0, 4  ;;  %s106_s9 = smov [#allocation2]   ;;  %s13_s8 = int_to_ptr.hbm [resolvable:$true] %s12_s8 }
   0x2   :  { %s14_s10 = sshll.u32 %s106_s9, 4  ;;  %s107_s11 = smov 128   ;;  %s15_s10 = int_to_ptr.vmem [resolvable:$true] %s14_s10 }
   0x3   :  { %s108_s12 = smov 8  }
   0x4   :  { %20 = dma.hbm_to_vmem [thread:$0]  %s13_s8, 256, %s15_s10, [#allocation3], %s107_s11, %s107_s11, %s108_s12  }
   0x5   :  { %102 = dma.done.wait [#allocation3], 256  }
   0x6   :  { %103 = vsyncadd [#allocation3], 4294967040  ;;  %s109_s13 = smov [#allocation5]   ;;  %s37_s17 = sshll.u32 %s127_s1, 4  ;;  %v25_v0 = vld [vmem:[#allocation2] sm:$0xff]  ;;  %v26_v1 = vld [vmem:[#allocation2 + $0x8] sm:$0xff]  ;;  %s38_s17 = int_to_ptr.hbm [resolvable:$true] %s37_s17 }
   0x7   :  { %s35_s14 = sshll.u32 %s109_s13, 4  ;;  %v27_v2 = vmax.f32 %v25_v0, 0.0  ;;  %v28_v3 = vmax.f32 %v26_v1, 0.0  ;;  %s36_s14 = int_to_ptr.vmem [resolvable:$true] %s35_s14 }
   0x9   :  { %29 = vst [vmem:[#allocation5] sm:$0xff] %v27_v2 }
   0xa   :  { %30 = vst [vmem:[#allocation5 + $0x8] sm:$0xff] %v28_v3 }
   0xb   :  { %43 = dma.vmem_to_hbm [thread:$0]  %s36_s14, 256, %s38_s17, [#allocation4], %s107_s11, %s107_s11, %s108_s12  }
   0xc   :  { %104 = dma.done.wait [#allocation4], 256  }
   0xd   :  { %105 = vsyncadd [#allocation4], 4294967040 }
   0xe   :  { %48 = vsyncpa [#allocation3], 1 }
   0xf   :  { %49 = vsyncpa [#allocation4], 1 }

</bundles_post_ra>
